<compile_context>
chip_gen: v5e
topology: v5e:2x2
jax: 0.10.0
libtpu: 0.0.40
codegen_flags: <defaults>
</compile_context>

<pallas_src>
import functools

import jax
import jax.numpy as jnp
from jax.experimental import pallas as pl
from jax.experimental.pallas import tpu as pltpu

NEG_SENTINEL = -1.0e30              # below any real (non-negative) loss value
TILE_BYTES = 4 * 1024 * 1024        # target bytes per pred/gt block (x2 inputs x2 buffers)
VMEM_LIMIT_BYTES = 48 * 1024 * 1024 # explicit scoped-VMEM budget (safe on v7x's 64 MiB)
LANE = 128
SUBLANE = 8


def _cdiv(a, b):
    return -(-a // b)


def _ohkm_mse_kernel(*refs, topk, bb, batch, hw, hw_chunk, num_hw_chunks,
                     nb_per_core, inv_norm, use_weight, mask_rows):
    if use_weight:
        pred_ref, gt_ref, w_ref, out_ref, ssum_ref = refs
    else:
        pred_ref, gt_ref, out_ref, ssum_ref = refs
        w_ref = None

    p = pl.program_id(0)   # core / partial index            ("parallel")
    i = pl.program_id(1)   # row-block index within the core ("arbitrary")
    h = pl.program_id(2)   # spatial chunk index             ("arbitrary")

    # Per-core partial-sum output block: zero once per core.
    @pl.when(jnp.logical_and(i == 0, h == 0))
    def _():
        out_ref[...] = jnp.zeros_like(out_ref)

    # Fresh spatial-sum accumulator for every (core, row-block).
    @pl.when(h == 0)
    def _():
        ssum_ref[...] = jnp.zeros_like(ssum_ref)

    # Elementwise diff on the lane-dense (bb, J, hw_chunk) block; upcast on read.
    d = pred_ref[...].astype(jnp.float32) - gt_ref[...].astype(jnp.float32)
    sq = d * d
    if num_hw_chunks * hw_chunk > hw:   # static: only the tail chunk has padded lanes
        lane_idx = jax.lax.broadcasted_iota(jnp.int32, sq.shape, 2) + h * hw_chunk
        sq = jnp.where(lane_idx < hw, sq, 0.0)
    ssum_ref[...] += jnp.sum(sq, axis=-1)            # (bb, J) partial spatial sums

    # Epilogue on the last spatial chunk: weights, top-k peel, accumulate.
    @pl.when(h == num_hw_chunks - 1)
    def _():
        s = ssum_ref[...]                            # (bb, J)
        if use_weight:
            # 0.5 * sum((w*p - w*g)^2) == 0.5 * w^2 * sum((p - g)^2)
            w = w_ref[...].astype(jnp.float32)       # (bb, J)
            loss = 0.5 * (w * w) * s
        else:
            loss = 0.5 * s

        if mask_rows:                                # static: only when coverage > batch
            blk = p * nb_per_core + i                # unclamped global block index
            row = jax.lax.broadcasted_iota(jnp.int32, loss.shape, 0) + blk * bb
            loss = jnp.where(row < batch, loss, 0.0)

        # Online hard keypoint mining: per sample, sum of the top-k joint losses.
        # k rounds of "peel the current distinct maximum and count its multiplicity"
        # -> identical sum to torch.topk (ties included); masked rows contribute 0.
        thr = jnp.full((bb, 1), 3.0e38, dtype=jnp.float32)
        remaining = jnp.full((bb, 1), float(topk), dtype=jnp.float32)
        total = jnp.zeros((bb, 1), dtype=jnp.float32)
        for _ in range(topk):
            masked = jnp.where(loss < thr, loss, NEG_SENTINEL)
            m = jnp.max(masked, axis=1, keepdims=True)
            c = jnp.sum(jnp.where(loss == m, 1.0, 0.0), axis=1, keepdims=True)
            take = jnp.minimum(c, remaining)
            total = total + jnp.where(take > 0.0, m * take, 0.0)
            remaining = remaining - take
            thr = m

        out_ref[...] += jnp.sum(total) * inv_norm


def heatmap_ohkm_mse_loss(output, target, target_weight=None, *, topk=8,
                          use_target_weight=True, block_bytes=TILE_BYTES):
    """Pallas implementation of HeatmapOHKMMSELoss.forward. Returns scalar f32."""
    batch, joints = int(output.shape[0]), int(output.shape[1])
    hw = 1
    for dim in output.shape[2:]:
        hw *= int(dim)
    assert joints >= topk, "topk must not exceed the number of joints"

    pred = output.reshape(batch, joints, hw)   # free reshape; native dtype streamed
    gt = target.reshape(batch, joints, hw)
    itemsize = jnp.dtype(pred.dtype).itemsize

    # --- block sizing (accounts for sublane padding of J and lane padding of HW) ---
    j_pad = _cdiv(joints, SUBLANE) * SUBLANE
    full_hw_lane = _cdiv(hw, LANE) * LANE
    per_row_full = j_pad * full_hw_lane * itemsize   # one sample, fully padded, in VMEM

    if batch * per_row_full <= block_bytes:
        bb, hw_chunk, num_hw_chunks = batch, hw, 1           # whole problem in one block
    elif SUBLANE * per_row_full <= block_bytes:
        bb = (block_bytes // per_row_full) // SUBLANE * SUBLANE   # 8-aligned row blocks
        hw_chunk, num_hw_chunks = hw, 1
    else:
        # Large heatmaps: fix a small 8-aligned row block and chunk the spatial axis
        # in lane-aligned pieces (long contiguous DMA runs per row).
        bb = SUBLANE if batch >= SUBLANE else batch
        hw_chunk = max(LANE, (block_bytes // (bb * j_pad * itemsize)) // LANE * LANE)
        if hw_chunk >= hw:
            hw_chunk, num_hw_chunks = hw, 1
        else:
            num_hw_chunks = _cdiv(hw, hw_chunk)

    nb_total = _cdiv(batch, bb)
    num_cores = 2 if nb_total >= 2 else 1          # v7x megacore; extra loop dim elsewhere
    nb_per_core = _cdiv(nb_total, num_cores)
    mask_rows = (num_cores * nb_per_core * bb) > batch
    last_block = nb_total - 1                      # clamp keeps every DMA in-bounds;
                                                   # duplicated blocks are fully masked.

    def data_map(p, i, h):
        return (jnp.minimum(p * nb_per_core + i, last_block), 0, h)

    def w_map(p, i, h):
        return (jnp.minimum(p * nb_per_core + i, last_block), 0)

    in_specs = [
        pl.BlockSpec((bb, joints, hw_chunk), data_map),
        pl.BlockSpec((bb, joints, hw_chunk), data_map),
    ]
    args = [pred, gt]
    if use_target_weight:
        w = target_weight.reshape(batch, joints).astype(jnp.float32)
        in_specs.append(pl.BlockSpec((bb, joints), w_map))   # bb is 8-aligned or == batch
        args.append(w)

    kernel = functools.partial(
        _ohkm_mse_kernel,
        topk=int(topk), bb=bb, batch=batch, hw=hw, hw_chunk=hw_chunk,
        num_hw_chunks=num_hw_chunks, nb_per_core=nb_per_core,
        inv_norm=1.0 / (float(topk) * float(batch)),
        use_weight=bool(use_target_weight), mask_rows=bool(mask_rows))

    cost = pl.CostEstimate(
        flops=3 * batch * joints * hw,
        transcendentals=0,
        bytes_accessed=2 * batch * joints * hw * itemsize
        + (batch * joints * 4 if use_target_weight else 0)
        + num_cores * SUBLANE * LANE * 4)

    out = pl.pallas_call(
        kernel,
        out_shape=jax.ShapeDtypeStruct((num_cores, SUBLANE, LANE), jnp.float32),
        grid_spec=pltpu.PrefetchScalarGridSpec(
            num_scalar_prefetch=0,
            grid=(num_cores, nb_per_core, num_hw_chunks),
            in_specs=in_specs,
            out_specs=pl.BlockSpec((1, SUBLANE, LANE), lambda p, i, h: (p, 0, 0)),
            scratch_shapes=[pltpu.VMEM((bb, joints), jnp.float32)],
        ),
        compiler_params=pltpu.CompilerParams(
            dimension_semantics=("parallel", "arbitrary", "arbitrary"),
            vmem_limit_bytes=VMEM_LIMIT_BYTES,
        ),
        cost_estimate=cost,
    )(*args)
    # Each per-core block holds its partial sum broadcast across the (8,128) tile.
    return jnp.sum(out[:, 0, 0])


def heatmap_ohkm_mse_loss_ref(output, target, target_weight=None, *, topk=8,
                              use_target_weight=True):
    """Pure-JAX reference mirroring the PyTorch module."""
    batch, joints = output.shape[0], output.shape[1]
    pred = output.reshape(batch, joints, -1).astype(jnp.float32)
    gt = target.reshape(batch, joints, -1).astype(jnp.float32)
    if use_target_weight:
        w = target_weight.reshape(batch, joints, 1).astype(jnp.float32)
        pred = pred * w
        gt = gt * w
    loss = 0.5 * jnp.sum((pred - gt) ** 2, axis=2)          # (B, J)
    topk_vals, _ = jax.lax.top_k(loss, topk)                # (B, topk)
    return jnp.mean(jnp.sum(topk_vals, axis=1) / topk)


if __name__ == "__main__":
    key = jax.random.PRNGKey(0)
    k1, k2, k3 = jax.random.split(key, 3)

    # Case 1: small f32, weighted (single block, no spatial chunking).
    B, J, H, W = 2, 16, 16, 16
    output = jax.random.normal(k1, (B, J, H, W), dtype=jnp.float32)
    target = jax.random.normal(k2, (B, J, H, W), dtype=jnp.float32)
    target_weight = (jax.random.uniform(k3, (B, J, 1)) > 0.3).astype(jnp.float32)

    loss = jax.block_until_ready(
        heatmap_ohkm_mse_loss(output, target, target_weight, topk=8))
    ref = jax.block_until_ready(
        heatmap_ohkm_mse_loss_ref(output, target, target_weight, topk=8))
    assert jnp.allclose(loss, ref, rtol=1e-4, atol=1e-5), (loss, ref)

    # Case 2: unweighted path (weight input / DMA dropped entirely).
    loss_nw = jax.block_until_ready(
        heatmap_ohkm_mse_loss(output, target, use_target_weight=False))
    ref_nw = jax.block_until_ready(
        heatmap_ohkm_mse_loss_ref(output, target, use_target_weight=False))
    assert jnp.allclose(loss_nw, ref_nw, rtol=1e-4, atol=1e-5), (loss_nw, ref_nw)

    # Case 3: bf16 pred/gt streamed end-to-end (half HBM bytes; in-kernel upcast).
    out_bf = output.astype(jnp.bfloat16)
    tgt_bf = target.astype(jnp.bfloat16)
    loss_bf = jax.block_until_ready(
        heatmap_ohkm_mse_loss(out_bf, tgt_bf, target_weight, topk=8))
    ref_bf = jax.block_until_ready(
        heatmap_ohkm_mse_loss_ref(out_bf, tgt_bf, target_weight, topk=8))
    assert jnp.allclose(loss_bf, ref_bf, rtol=1e-3, atol=1e-5), (loss_bf, ref_bf)

    # Case 4: awkward shapes + tiny block budget -> exercises 8-row blocks, spatial
    # chunking, tail-row / tail-lane masking, index clamping and the 2-partial grid.
    k4, k5, k6 = jax.random.split(jax.random.PRNGKey(1), 3)
    B2, J2, H2, W2 = 17, 17, 24, 24
    out2 = jax.random.normal(k4, (B2, J2, H2, W2), dtype=jnp.float32)
    tgt2 = jax.random.normal(k5, (B2, J2, H2, W2), dtype=jnp.float32)
    w2 = (jax.random.uniform(k6, (B2, J2, 1)) > 0.3).astype(jnp.float32)
    loss2 = jax.block_until_ready(
        heatmap_ohkm_mse_loss(out2, tgt2, w2, topk=8, block_bytes=8192))
    ref2 = jax.block_until_ready(heatmap_ohkm_mse_loss_ref(out2, tgt2, w2, topk=8))
    assert jnp.allclose(loss2, ref2, rtol=1e-4, atol=1e-5), (loss2, ref2)

    print("KERNEL_OK")
</pallas_src>

<mosaic_0001>
module attributes {stable_mosaic.version = 11 : i64} {
  func.func @_ohkm_mse_kernel(%arg0: i32, %arg1: i32, %arg2: i32, %arg3: memref<2x16x256xf32, #tpu.memory_space<vmem>>, %arg4: memref<2x16x256xf32, #tpu.memory_space<vmem>>, %arg5: memref<2x16xf32, #tpu.memory_space<vmem>>, %arg6: memref<1x8x128xf32, #tpu.memory_space<vmem>>, %arg7: memref<2x16xf32, #tpu.memory_space<vmem>>) attributes {dimension_semantics = [#tpu.dimension_semantics<parallel>, #tpu.dimension_semantics<arbitrary>, #tpu.dimension_semantics<arbitrary>], iteration_bounds = array<i64: 1, 1, 1>, scalar_prefetch = 0 : i64, scratch_operands = 1 : i64, tpu.core_type = #tpu.core_type<tc>, window_params = [{transform_indices = @transform_0, window_bounds = array<i64: 2, 16, 256>}, {transform_indices = @transform_1, window_bounds = array<i64: 2, 16, 256>}, {transform_indices = @transform_2, window_bounds = array<i64: 2, 16>}, {transform_indices = @transform_3, window_bounds = array<i64: 1, 8, 128>}]} {
    %c0_i32 = arith.constant 0 : i32
    %0 = arith.cmpi eq, %arg1, %c0_i32 : i32
    %c0_i32_0 = arith.constant 0 : i32
    %1 = arith.cmpi eq, %arg2, %c0_i32_0 : i32
    %2 = arith.andi %0, %1 : i1
    %3 = arith.extui %2 : i1 to i32
    %c0_i32_1 = arith.constant 0 : i32
    %4 = arith.cmpi ne, %3, %c0_i32_1 : i32
    scf.if %4 {
      %cst_15 = arith.constant 0.000000e+00 : f32
      %19 = vector.broadcast %cst_15 : f32 to vector<1x8x128xf32>
      %c0_16 = arith.constant 0 : index
      %c0_17 = arith.constant 0 : index
      %c0_18 = arith.constant 0 : index
      %20 = vector.load %arg6[%c0_16, %c0_17, %c0_18] : memref<1x8x128xf32, #tpu.memory_space<vmem>>, vector<1x8x128xf32>
      tpu.vector_store %arg6[%c0_16, %c0_17, %c0_18], %19 {strides = array<i32>} : memref<1x8x128xf32, #tpu.memory_space<vmem>>, vector<1x8x128xf32>,
    } else {
    }
    %c0_i32_2 = arith.constant 0 : i32
    %5 = arith.cmpi eq, %arg2, %c0_i32_2 : i32
    %6 = arith.extui %5 : i1 to i32
    %c0_i32_3 = arith.constant 0 : i32
    %7 = arith.cmpi ne, %6, %c0_i32_3 : i32
    scf.if %7 {
      %cst_15 = arith.constant 0.000000e+00 : f32
      %19 = vector.broadcast %cst_15 : f32 to vector<2x16xf32>
      %c0_16 = arith.constant 0 : index
      %c0_17 = arith.constant 0 : index
      %20 = vector.load %arg7[%c0_16, %c0_17] : memref<2x16xf32, #tpu.memory_space<vmem>>, vector<2x16xf32>
      tpu.vector_store %arg7[%c0_16, %c0_17], %19 {strides = array<i32>} : memref<2x16xf32, #tpu.memory_space<vmem>>, vector<2x16xf32>,
    } else {
    }
    %c0 = arith.constant 0 : index
    %c0_4 = arith.constant 0 : index
    %c0_5 = arith.constant 0 : index
    %8 = vector.load %arg3[%c0, %c0_4, %c0_5] : memref<2x16x256xf32, #tpu.memory_space<vmem>>, vector<2x16x256xf32>
    %c0_6 = arith.constant 0 : index
    %c0_7 = arith.constant 0 : index
    %c0_8 = arith.constant 0 : index
    %9 = vector.load %arg4[%c0_6, %c0_7, %c0_8] : memref<2x16x256xf32, #tpu.memory_space<vmem>>, vector<2x16x256xf32>
    %10 = arith.subf %8, %9 : vector<2x16x256xf32>
    %11 = arith.mulf %10, %10 : vector<2x16x256xf32>
    %c0_9 = arith.constant 0 : index
    %c0_10 = arith.constant 0 : index
    %12 = vector.load %arg7[%c0_9, %c0_10] : memref<2x16xf32, #tpu.memory_space<vmem>>, vector<2x16xf32>
    %cst = arith.constant dense<0.000000e+00> : vector<2x16xf32>
    %13 = vector.multi_reduction <add>, %11, %cst [2] : vector<2x16x256xf32> to vector<2x16xf32>
    %14 = arith.addf %12, %13 : vector<2x16xf32>
    %c0_11 = arith.constant 0 : index
    %c0_12 = arith.constant 0 : index
    %15 = vector.load %arg7[%c0_11, %c0_12] : memref<2x16xf32, #tpu.memory_space<vmem>>, vector<2x16xf32>
    tpu.vector_store %arg7[%c0_11, %c0_12], %14 {strides = array<i32>} : memref<2x16xf32, #tpu.memory_space<vmem>>, vector<2x16xf32>,
    %c0_i32_13 = arith.constant 0 : i32
    %16 = arith.cmpi eq, %arg2, %c0_i32_13 : i32
    %17 = arith.extui %16 : i1 to i32
    %c0_i32_14 = arith.constant 0 : i32
    %18 = arith.cmpi ne, %17, %c0_i32_14 : i32
    scf.if %18 {
      %c0_15 = arith.constant 0 : index
      %c0_16 = arith.constant 0 : index
      %19 = vector.load %arg7[%c0_15, %c0_16] : memref<2x16xf32, #tpu.memory_space<vmem>>, vector<2x16xf32>
      %c0_17 = arith.constant 0 : index
      %c0_18 = arith.constant 0 : index
      %20 = vector.load %arg5[%c0_17, %c0_18] : memref<2x16xf32, #tpu.memory_space<vmem>>, vector<2x16xf32>
      %21 = arith.mulf %20, %20 : vector<2x16xf32>
      %cst_19 = arith.constant 5.000000e-01 : f32
      %22 = vector.broadcast %cst_19 : f32 to vector<2x16xf32>
      %23 = arith.mulf %22, %21 : vector<2x16xf32>
      %24 = arith.mulf %23, %19 : vector<2x16xf32>
      %cst_20 = arith.constant 3.000000e+38 : f32
      %25 = vector.broadcast %cst_20 : f32 to vector<2x1xf32>
      %cst_21 = arith.constant 8.000000e+00 : f32
      %26 = vector.broadcast %cst_21 : f32 to vector<2x1xf32>
      %cst_22 = arith.constant 0.000000e+00 : f32
      %27 = vector.broadcast %cst_22 : f32 to vector<2x1xf32>
      %28 = vector.broadcast %25 : vector<2x1xf32> to vector<2x16xf32>
      %29 = arith.cmpf olt, %24, %28 : vector<2x16xf32>
      %cst_23 = arith.constant -1.000000e+30 : f32
      %30 = vector.broadcast %cst_23 : f32 to vector<2x16xf32>
      %31 = arith.select %29, %24, %30 : vector<2x16xi1>, vector<2x16xf32>
      %cst_24 = arith.constant dense<0xFF800000> : vector<2xf32>
      %32 = vector.multi_reduction <maximumf>, %31, %cst_24 [1] : vector<2x16xf32> to vector<2xf32>
      %33 = vector.shape_cast %32 : vector<2xf32> to vector<2x1xf32>
      %34 = vector.broadcast %33 : vector<2x1xf32> to vector<2x16xf32>
      %35 = arith.cmpf oeq, %24, %34 : vector<2x16xf32>
      %cst_25 = arith.constant 1.000000e+00 : f32
      %cst_26 = arith.constant 0.000000e+00 : f32
      %36 = vector.broadcast %cst_25 : f32 to vector<2x16xf32>
      %37 = vector.broadcast %cst_26 : f32 to vector<2x16xf32>
      %38 = arith.select %35, %36, %37 : vector<2x16xi1>, vector<2x16xf32>
      %cst_27 = arith.constant dense<0.000000e+00> : vector<2xf32>
      %39 = vector.multi_reduction <add>, %38, %cst_27 [1] : vector<2x16xf32> to vector<2xf32>
      %40 = vector.shape_cast %39 : vector<2xf32> to vector<2x1xf32>
      %41 = arith.minimumf %40, %26 : vector<2x1xf32>
      %cst_28 = arith.constant 0.000000e+00 : f32
      %42 = vector.broadcast %cst_28 : f32 to vector<2x1xf32>
      %43 = arith.cmpf ogt, %41, %42 : vector<2x1xf32>
      %44 = arith.mulf %33, %41 : vector<2x1xf32>
      %cst_29 = arith.constant 0.000000e+00 : f32
      %45 = vector.broadcast %cst_29 : f32 to vector<2x1xf32>
      %46 = arith.select %43, %44, %45 : vector<2x1xi1>, vector<2x1xf32>
      %47 = arith.addf %27, %46 : vector<2x1xf32>
      %48 = arith.subf %26, %41 : vector<2x1xf32>
      %49 = vector.broadcast %33 : vector<2x1xf32> to vector<2x16xf32>
      %50 = arith.cmpf olt, %24, %49 : vector<2x16xf32>
      %cst_30 = arith.constant -1.000000e+30 : f32
      %51 = vector.broadcast %cst_30 : f32 to vector<2x16xf32>
      %52 = arith.select %50, %24, %51 : vector<2x16xi1>, vector<2x16xf32>
      %cst_31 = arith.constant dense<0xFF800000> : vector<2xf32>
      %53 = vector.multi_reduction <maximumf>, %52, %cst_31 [1] : vector<2x16xf32> to vector<2xf32>
      %54 = vector.shape_cast %53 : vector<2xf32> to vector<2x1xf32>
      %55 = vector.broadcast %54 : vector<2x1xf32> to vector<2x16xf32>
      %56 = arith.cmpf oeq, %24, %55 : vector<2x16xf32>
      %cst_32 = arith.constant 1.000000e+00 : f32
      %cst_33 = arith.constant 0.000000e+00 : f32
      %57 = vector.broadcast %cst_32 : f32 to vector<2x16xf32>
      %58 = vector.broadcast %cst_33 : f32 to vector<2x16xf32>
      %59 = arith.select %56, %57, %58 : vector<2x16xi1>, vector<2x16xf32>
      %cst_34 = arith.constant dense<0.000000e+00> : vector<2xf32>
      %60 = vector.multi_reduction <add>, %59, %cst_34 [1] : vector<2x16xf32> to vector<2xf32>
      %61 = vector.shape_cast %60 : vector<2xf32> to vector<2x1xf32>
      %62 = arith.minimumf %61, %48 : vector<2x1xf32>
      %cst_35 = arith.constant 0.000000e+00 : f32
      %63 = vector.broadcast %cst_35 : f32 to vector<2x1xf32>
      %64 = arith.cmpf ogt, %62, %63 : vector<2x1xf32>
      %65 = arith.mulf %54, %62 : vector<2x1xf32>
      %cst_36 = arith.constant 0.000000e+00 : f32
      %66 = vector.broadcast %cst_36 : f32 to vector<2x1xf32>
      %67 = arith.select %64, %65, %66 : vector<2x1xi1>, vector<2x1xf32>
      %68 = arith.addf %47, %67 : vector<2x1xf32>
      %69 = arith.subf %48, %62 : vector<2x1xf32>
      %70 = vector.broadcast %54 : vector<2x1xf32> to vector<2x16xf32>
      %71 = arith.cmpf olt, %24, %70 : vector<2x16xf32>
      %cst_37 = arith.constant -1.000000e+30 : f32
      %72 = vector.broadcast %cst_37 : f32 to vector<2x16xf32>
      %73 = arith.select %71, %24, %72 : vector<2x16xi1>, vector<2x16xf32>
      %cst_38 = arith.constant dense<0xFF800000> : vector<2xf32>
      %74 = vector.multi_reduction <maximumf>, %73, %cst_38 [1] : vector<2x16xf32> to vector<2xf32>
      %75 = vector.shape_cast %74 : vector<2xf32> to vector<2x1xf32>
      %76 = vector.broadcast %75 : vector<2x1xf32> to vector<2x16xf32>
      %77 = arith.cmpf oeq, %24, %76 : vector<2x16xf32>
      %cst_39 = arith.constant 1.000000e+00 : f32
      %cst_40 = arith.constant 0.000000e+00 : f32
      %78 = vector.broadcast %cst_39 : f32 to vector<2x16xf32>
      %79 = vector.broadcast %cst_40 : f32 to vector<2x16xf32>
      %80 = arith.select %77, %78, %79 : vector<2x16xi1>, vector<2x16xf32>
      %cst_41 = arith.constant dense<0.000000e+00> : vector<2xf32>
      %81 = vector.multi_reduction <add>, %80, %cst_41 [1] : vector<2x16xf32> to vector<2xf32>
      %82 = vector.shape_cast %81 : vector<2xf32> to vector<2x1xf32>
      %83 = arith.minimumf %82, %69 : vector<2x1xf32>
      %cst_42 = arith.constant 0.000000e+00 : f32
      %84 = vector.broadcast %cst_42 : f32 to vector<2x1xf32>
      %85 = arith.cmpf ogt, %83, %84 : vector<2x1xf32>
      %86 = arith.mulf %75, %83 : vector<2x1xf32>
      %cst_43 = arith.constant 0.000000e+00 : f32
      %87 = vector.broadcast %cst_43 : f32 to vector<2x1xf32>
      %88 = arith.select %85, %86, %87 : vector<2x1xi1>, vector<2x1xf32>
      %89 = arith.addf %68, %88 : vector<2x1xf32>
      %90 = arith.subf %69, %83 : vector<2x1xf32>
      %91 = vector.broadcast %75 : vector<2x1xf32> to vector<2x16xf32>
      %92 = arith.cmpf olt, %24, %91 : vector<2x16xf32>
      %cst_44 = arith.constant -1.000000e+30 : f32
      %93 = vector.broadcast %cst_44 : f32 to vector<2x16xf32>
      %94 = arith.select %92, %24, %93 : vector<2x16xi1>, vector<2x16xf32>
      %cst_45 = arith.constant dense<0xFF800000> : vector<2xf32>
      %95 = vector.multi_reduction <maximumf>, %94, %cst_45 [1] : vector<2x16xf32> to vector<2xf32>
      %96 = vector.shape_cast %95 : vector<2xf32> to vector<2x1xf32>
      %97 = vector.broadcast %96 : vector<2x1xf32> to vector<2x16xf32>
      %98 = arith.cmpf oeq, %24, %97 : vector<2x16xf32>
      %cst_46 = arith.constant 1.000000e+00 : f32
      %cst_47 = arith.constant 0.000000e+00 : f32
      %99 = vector.broadcast %cst_46 : f32 to vector<2x16xf32>
      %100 = vector.broadcast %cst_47 : f32 to vector<2x16xf32>
      %101 = arith.select %98, %99, %100 : vector<2x16xi1>, vector<2x16xf32>
      %cst_48 = arith.constant dense<0.000000e+00> : vector<2xf32>
      %102 = vector.multi_reduction <add>, %101, %cst_48 [1] : vector<2x16xf32> to vector<2xf32>
      %103 = vector.shape_cast %102 : vector<2xf32> to vector<2x1xf32>
      %104 = arith.minimumf %103, %90 : vector<2x1xf32>
      %cst_49 = arith.constant 0.000000e+00 : f32
      %105 = vector.broadcast %cst_49 : f32 to vector<2x1xf32>
      %106 = arith.cmpf ogt, %104, %105 : vector<2x1xf32>
      %107 = arith.mulf %96, %104 : vector<2x1xf32>
      %cst_50 = arith.constant 0.000000e+00 : f32
      %108 = vector.broadcast %cst_50 : f32 to vector<2x1xf32>
      %109 = arith.select %106, %107, %108 : vector<2x1xi1>, vector<2x1xf32>
      %110 = arith.addf %89, %109 : vector<2x1xf32>
      %111 = arith.subf %90, %104 : vector<2x1xf32>
      %112 = vector.broadcast %96 : vector<2x1xf32> to vector<2x16xf32>
      %113 = arith.cmpf olt, %24, %112 : vector<2x16xf32>
      %cst_51 = arith.constant -1.000000e+30 : f32
      %114 = vector.broadcast %cst_51 : f32 to vector<2x16xf32>
      %115 = arith.select %113, %24, %114 : vector<2x16xi1>, vector<2x16xf32>
      %cst_52 = arith.constant dense<0xFF800000> : vector<2xf32>
      %116 = vector.multi_reduction <maximumf>, %115, %cst_52 [1] : vector<2x16xf32> to vector<2xf32>
      %117 = vector.shape_cast %116 : vector<2xf32> to vector<2x1xf32>
      %118 = vector.broadcast %117 : vector<2x1xf32> to vector<2x16xf32>
      %119 = arith.cmpf oeq, %24, %118 : vector<2x16xf32>
      %cst_53 = arith.constant 1.000000e+00 : f32
      %cst_54 = arith.constant 0.000000e+00 : f32
      %120 = vector.broadcast %cst_53 : f32 to vector<2x16xf32>
      %121 = vector.broadcast %cst_54 : f32 to vector<2x16xf32>
      %122 = arith.select %119, %120, %121 : vector<2x16xi1>, vector<2x16xf32>
      %cst_55 = arith.constant dense<0.000000e+00> : vector<2xf32>
      %123 = vector.multi_reduction <add>, %122, %cst_55 [1] : vector<2x16xf32> to vector<2xf32>
      %124 = vector.shape_cast %123 : vector<2xf32> to vector<2x1xf32>
      %125 = arith.minimumf %124, %111 : vector<2x1xf32>
      %cst_56 = arith.constant 0.000000e+00 : f32
      %126 = vector.broadcast %cst_56 : f32 to vector<2x1xf32>
      %127 = arith.cmpf ogt, %125, %126 : vector<2x1xf32>
      %128 = arith.mulf %117, %125 : vector<2x1xf32>
      %cst_57 = arith.constant 0.000000e+00 : f32
      %129 = vector.broadcast %cst_57 : f32 to vector<2x1xf32>
      %130 = arith.select %127, %128, %129 : vector<2x1xi1>, vector<2x1xf32>
      %131 = arith.addf %110, %130 : vector<2x1xf32>
      %132 = arith.subf %111, %125 : vector<2x1xf32>
      %133 = vector.broadcast %117 : vector<2x1xf32> to vector<2x16xf32>
      %134 = arith.cmpf olt, %24, %133 : vector<2x16xf32>
      %cst_58 = arith.constant -1.000000e+30 : f32
      %135 = vector.broadcast %cst_58 : f32 to vector<2x16xf32>
      %136 = arith.select %134, %24, %135 : vector<2x16xi1>, vector<2x16xf32>
      %cst_59 = arith.constant dense<0xFF800000> : vector<2xf32>
      %137 = vector.multi_reduction <maximumf>, %136, %cst_59 [1] : vector<2x16xf32> to vector<2xf32>
      %138 = vector.shape_cast %137 : vector<2xf32> to vector<2x1xf32>
      %139 = vector.broadcast %138 : vector<2x1xf32> to vector<2x16xf32>
      %140 = arith.cmpf oeq, %24, %139 : vector<2x16xf32>
      %cst_60 = arith.constant 1.000000e+00 : f32
      %cst_61 = arith.constant 0.000000e+00 : f32
      %141 = vector.broadcast %cst_60 : f32 to vector<2x16xf32>
      %142 = vector.broadcast %cst_61 : f32 to vector<2x16xf32>
      %143 = arith.select %140, %141, %142 : vector<2x16xi1>, vector<2x16xf32>
      %cst_62 = arith.constant dense<0.000000e+00> : vector<2xf32>
      %144 = vector.multi_reduction <add>, %143, %cst_62 [1] : vector<2x16xf32> to vector<2xf32>
      %145 = vector.shape_cast %144 : vector<2xf32> to vector<2x1xf32>
      %146 = arith.minimumf %145, %132 : vector<2x1xf32>
      %cst_63 = arith.constant 0.000000e+00 : f32
      %147 = vector.broadcast %cst_63 : f32 to vector<2x1xf32>
      %148 = arith.cmpf ogt, %146, %147 : vector<2x1xf32>
      %149 = arith.mulf %138, %146 : vector<2x1xf32>
      %cst_64 = arith.constant 0.000000e+00 : f32
      %150 = vector.broadcast %cst_64 : f32 to vector<2x1xf32>
      %151 = arith.select %148, %149, %150 : vector<2x1xi1>, vector<2x1xf32>
      %152 = arith.addf %131, %151 : vector<2x1xf32>
      %153 = arith.subf %132, %146 : vector<2x1xf32>
      %154 = vector.broadcast %138 : vector<2x1xf32> to vector<2x16xf32>
      %155 = arith.cmpf olt, %24, %154 : vector<2x16xf32>
      %cst_65 = arith.constant -1.000000e+30 : f32
      %156 = vector.broadcast %cst_65 : f32 to vector<2x16xf32>
      %157 = arith.select %155, %24, %156 : vector<2x16xi1>, vector<2x16xf32>
      %cst_66 = arith.constant dense<0xFF800000> : vector<2xf32>
      %158 = vector.multi_reduction <maximumf>, %157, %cst_66 [1] : vector<2x16xf32> to vector<2xf32>
      %159 = vector.shape_cast %158 : vector<2xf32> to vector<2x1xf32>
      %160 = vector.broadcast %159 : vector<2x1xf32> to vector<2x16xf32>
      %161 = arith.cmpf oeq, %24, %160 : vector<2x16xf32>
      %cst_67 = arith.constant 1.000000e+00 : f32
      %cst_68 = arith.constant 0.000000e+00 : f32
      %162 = vector.broadcast %cst_67 : f32 to vector<2x16xf32>
      %163 = vector.broadcast %cst_68 : f32 to vector<2x16xf32>
      %164 = arith.select %161, %162, %163 : vector<2x16xi1>, vector<2x16xf32>
      %cst_69 = arith.constant dense<0.000000e+00> : vector<2xf32>
      %165 = vector.multi_reduction <add>, %164, %cst_69 [1] : vector<2x16xf32> to vector<2xf32>
      %166 = vector.shape_cast %165 : vector<2xf32> to vector<2x1xf32>
      %167 = arith.minimumf %166, %153 : vector<2x1xf32>
      %cst_70 = arith.constant 0.000000e+00 : f32
      %168 = vector.broadcast %cst_70 : f32 to vector<2x1xf32>
      %169 = arith.cmpf ogt, %167, %168 : vector<2x1xf32>
      %170 = arith.mulf %159, %167 : vector<2x1xf32>
      %cst_71 = arith.constant 0.000000e+00 : f32
      %171 = vector.broadcast %cst_71 : f32 to vector<2x1xf32>
      %172 = arith.select %169, %170, %171 : vector<2x1xi1>, vector<2x1xf32>
      %173 = arith.addf %152, %172 : vector<2x1xf32>
      %174 = arith.subf %153, %167 : vector<2x1xf32>
      %175 = vector.broadcast %159 : vector<2x1xf32> to vector<2x16xf32>
      %176 = arith.cmpf olt, %24, %175 : vector<2x16xf32>
      %cst_72 = arith.constant -1.000000e+30 : f32
      %177 = vector.broadcast %cst_72 : f32 to vector<2x16xf32>
      %178 = arith.select %176, %24, %177 : vector<2x16xi1>, vector<2x16xf32>
      %cst_73 = arith.constant dense<0xFF800000> : vector<2xf32>
      %179 = vector.multi_reduction <maximumf>, %178, %cst_73 [1] : vector<2x16xf32> to vector<2xf32>
      %180 = vector.shape_cast %179 : vector<2xf32> to vector<2x1xf32>
      %181 = vector.broadcast %180 : vector<2x1xf32> to vector<2x16xf32>
      %182 = arith.cmpf oeq, %24, %181 : vector<2x16xf32>
      %cst_74 = arith.constant 1.000000e+00 : f32
      %cst_75 = arith.constant 0.000000e+00 : f32
      %183 = vector.broadcast %cst_74 : f32 to vector<2x16xf32>
      %184 = vector.broadcast %cst_75 : f32 to vector<2x16xf32>
      %185 = arith.select %182, %183, %184 : vector<2x16xi1>, vector<2x16xf32>
      %cst_76 = arith.constant dense<0.000000e+00> : vector<2xf32>
      %186 = vector.multi_reduction <add>, %185, %cst_76 [1] : vector<2x16xf32> to vector<2xf32>
      %187 = vector.shape_cast %186 : vector<2xf32> to vector<2x1xf32>
      %188 = arith.minimumf %187, %174 : vector<2x1xf32>
      %cst_77 = arith.constant 0.000000e+00 : f32
      %189 = vector.broadcast %cst_77 : f32 to vector<2x1xf32>
      %190 = arith.cmpf ogt, %188, %189 : vector<2x1xf32>
      %191 = arith.mulf %180, %188 : vector<2x1xf32>
      %cst_78 = arith.constant 0.000000e+00 : f32
      %192 = vector.broadcast %cst_78 : f32 to vector<2x1xf32>
      %193 = arith.select %190, %191, %192 : vector<2x1xi1>, vector<2x1xf32>
      %194 = arith.addf %173, %193 : vector<2x1xf32>
      %c0_79 = arith.constant 0 : index
      %c0_80 = arith.constant 0 : index
      %c0_81 = arith.constant 0 : index
      %195 = vector.load %arg6[%c0_79, %c0_80, %c0_81] : memref<1x8x128xf32, #tpu.memory_space<vmem>>, vector<1x8x128xf32>
      %196 = vector.shape_cast %194 : vector<2x1xf32> to vector<1x2x1xf32>
      %cst_82 = arith.constant dense<0.000000e+00> : vector<1xf32>
      %197 = vector.multi_reduction <add>, %196, %cst_82 [1, 2] : vector<1x2x1xf32> to vector<1xf32>
      %198 = vector.shape_cast %197 : vector<1xf32> to vector<1x1x1xf32>
      %199 = vector.extract %198[0, 0, 0] : f32 from vector<1x1x1xf32>
      %cst_83 = arith.constant 6.250000e-02 : f32
      %200 = arith.mulf %199, %cst_83 : f32
      %201 = vector.broadcast %200 : f32 to vector<1x8x128xf32>
      %202 = arith.addf %195, %201 : vector<1x8x128xf32>
      %c0_84 = arith.constant 0 : index
      %c0_85 = arith.constant 0 : index
      %c0_86 = arith.constant 0 : index
      %203 = vector.load %arg6[%c0_84, %c0_85, %c0_86] : memref<1x8x128xf32, #tpu.memory_space<vmem>>, vector<1x8x128xf32>
      tpu.vector_store %arg6[%c0_84, %c0_85, %c0_86], %202 {strides = array<i32>} : memref<1x8x128xf32, #tpu.memory_space<vmem>>, vector<1x8x128xf32>,
    } else {
    }
    return
  }
  func.func @transform_0(%arg0: i32, %arg1: i32, %arg2: i32) -> (i32, i32, i32) {
    %c1_i32 = arith.constant 1 : i32
    %0 = arith.muli %arg0, %c1_i32 : i32
    %1 = arith.addi %0, %arg1 : i32
    %c0_i32 = arith.constant 0 : i32
    %2 = arith.minsi %1, %c0_i32 : i32
    %c0_i32_0 = arith.constant 0 : i32
    %c0_i32_1 = arith.constant 0 : i32
    return %2, %c0_i32_0, %arg2 : i32, i32, i32
  }
  func.func @transform_1(%arg0: i32, %arg1: i32, %arg2: i32) -> (i32, i32, i32) {
    %c1_i32 = arith.constant 1 : i32
    %0 = arith.muli %arg0, %c1_i32 : i32
    %1 = arith.addi %0, %arg1 : i32
    %c0_i32 = arith.constant 0 : i32
    %2 = arith.minsi %1, %c0_i32 : i32
    %c0_i32_0 = arith.constant 0 : i32
    %c0_i32_1 = arith.constant 0 : i32
    return %2, %c0_i32_0, %arg2 : i32, i32, i32
  }
  func.func @transform_2(%arg0: i32, %arg1: i32, %arg2: i32) -> (i32, i32) {
    %c1_i32 = arith.constant 1 : i32
    %0 = arith.muli %arg0, %c1_i32 : i32
    %1 = arith.addi %0, %arg1 : i32
    %c0_i32 = arith.constant 0 : i32
    %2 = arith.minsi %1, %c0_i32 : i32
    %c0_i32_0 = arith.constant 0 : i32
    %c0_i32_1 = arith.constant 0 : i32
    return %2, %c0_i32_0 : i32, i32
  }
  func.func @transform_3(%arg0: i32, %arg1: i32, %arg2: i32) -> (i32, i32, i32) {
    %c0_i32 = arith.constant 0 : i32
    %c0_i32_0 = arith.constant 0 : i32
    %c0_i32_1 = arith.constant 0 : i32
    return %arg0, %c0_i32, %c0_i32_0 : i32, i32, i32
  }
}

</mosaic_0001>

<bundles_post_ra>
// kernel: tpu_custom_call.1
= control target key start
LH: loop header
LB: loop body
LE: loop exit
PB: predicated region body
PF: predicated region fallthrough
CT: control target
= control target key end

     0   :  { %8 = vsyncpa [#allocation4], 0  ;;  %s575_s0 = inlined_call_operand.hbm [shape: f32[2,16,256], index: 0, kind: input, shape index: {}]   ;;  %s576_s1 = inlined_call_operand.hbm [shape: f32[2,16,256], index: 1, kind: input, shape index: {}]   ;;  %s577_s2 = inlined_call_operand.hbm [shape: f32[2,16], index: 2, kind: input, shape index: {}]   ;;  %s578_s3 = inlined_call_operand.hbm [shape: f32[1,8,128], index: 3, kind: output, shape index: {}]  }
   0x1   :  { %9 = vsyncpa [#allocation7], 0 }
   0x2   :  { %10 = vsyncpa [#allocation5], 0  ;;  %s42_s14 = sshll.u32 %s576_s1, 4  ;;  %s453_s15 = smov [#allocation6]   ;;  %s43_s14 = int_to_ptr.hbm [resolvable:$true] %s42_s14 }
   0x3   :  { %s44_s16 = sshll.u32 %s453_s15, 4  ;;  %s22_s19 = sshll.u32 %s575_s0, 4  ;;  %s45_s16 = int_to_ptr.vmem [resolvable:$true] %s44_s16  ;;  %s23_s19 = int_to_ptr.hbm [resolvable:$true] %s22_s19 }
   0x4   :  { %s454_s20 = smov 256   ;;  %s455_s21 = smov 16  }
   0x5   :  { %50 = dma.hbm_to_vmem [thread:$0]  %s43_s14, 1024, %s45_s16, [#allocation7], %s454_s20, %s454_s20, %s455_s21  }
   0x6   :  { %s456_s22 = smov [#allocation3]   ;;  %s61_s26 = sshll.u32 %s577_s2, 4  ;;  %s62_s26 = int_to_ptr.hbm [resolvable:$true] %s61_s26 }
   0x7   :  { %s24_s23 = sshll.u32 %s456_s22, 4  ;;  %s457_s1 = smov [#allocation8]   ;;  %s25_s23 = int_to_ptr.vmem [resolvable:$true] %s24_s23 }
   0x8   :  { %30 = dma.hbm_to_vmem [thread:$0]  %s23_s19, 1024, %s25_s23, [#allocation4], %s454_s20, %s454_s20, %s455_s21  }
   0x9   :  { %s63_s27 = sshll.u32 %s457_s1, 4  ;;  %s64_s27 = int_to_ptr.vmem [resolvable:$true] %s63_s27 }
   0xa   :  { %66 = dma.hbm_to_vmem [thread:$0]  %s62_s26, 32, %s64_s27, [#allocation7]  }
   0xb   :  { %447 = dma.done.wait [#allocation4], 1024  }
   0xc   :  { %448 = vsyncadd [#allocation4], 4294966272 }
   0xd   :  { %449 = dma.done.wait [#allocation7], 1056  }
   0xe   :  { %450 = vsyncadd [#allocation7], 4294966240  ;;  %v106_v0 = vld [vmem:[#allocation3 + $0x20] sm:$0xff]  ;;  %v107_v1 = vld [vmem:[#allocation3 + $0x28] sm:$0xff]  ;;  %vm100_vm0 = vcmask 123904   ;;  %v458_v36 = vmov 0.0   ;;  %v151_v37 = vlaneseq }
   0xf   :  { %v114_v2 = vld [vmem:[#allocation6 + $0x20] sm:$0xff]  ;;  %v115_v3 = vld [vmem:[#allocation6 + $0x28] sm:$0xff]  ;;  %v108_v10 = vld [vmem:[#allocation3 + $0x30] sm:$0xff]  ;;  %101 = vst.msk [vmem:[#allocation2] sm:$0x3] %vm100_vm0, %v458_v36  ;;  %vm156_vm1 = vcmask 130112  }
  0x10   :  { %v122_v4 = vsub.f32 %v106_v0, %v114_v2  ;;  %v102_v5 = vld [vmem:[#allocation3] sm:$0xff]  ;;  %v103_v6 = vld [vmem:[#allocation3 + $0x8] sm:$0xff]  ;;  %v123_v7 = vsub.f32 %v107_v1, %v115_v3  ;;  %v109_v14 = vld [vmem:[#allocation3 + $0x38] sm:$0xff]  ;;  %v152_v40 = vand.u32 127, %v151_v37  ;;  %vm161_vm2 = vcmask 1041409   ;;  %s459_s2 = smov [#allocation9]  }
  0x11   :  { %v110_v8 = vld [vmem:[#allocation6] sm:$0xff]  ;;  %v111_v9 = vld [vmem:[#allocation6 + $0x8] sm:$0xff]  ;;  %v116_v15 = vld [vmem:[#allocation6 + $0x30] sm:$0xff]  ;;  %s323_s28 = sshll.u32 %s459_s2, 4  ;;  %s325_s5 = sshll.u32 %s578_s3, 4  ;;  %s324_s28 = int_to_ptr.vmem [resolvable:$true] %s323_s28  ;;  %s326_s5 = int_to_ptr.hbm [resolvable:$true] %s325_s5 }
  0x12   :  { %v130_v11 = vmul.f32 %v122_v4, %v122_v4  ;;  %v118_v12 = vsub.f32 %v102_v5, %v110_v8  ;;  %v119_v13 = vsub.f32 %v103_v6, %v111_v9  ;;  %v117_v16 = vld [vmem:[#allocation6 + $0x38] sm:$0xff]  ;;  %v131_v17 = vmul.f32 %v123_v7, %v123_v7  ;;  %v104_v20 = vld [vmem:[#allocation3 + $0x10] sm:$0xff]  ;;  %v171_v51 = vld [vmem:[#allocation8] sm:$0x3] }
  0x13   :  { %v124_v18 = vsub.f32 %v108_v10, %v116_v15  ;;  %v125_v19 = vsub.f32 %v109_v14, %v117_v16  ;;  %v105_v21 = vld [vmem:[#allocation3 + $0x18] sm:$0xff]  ;;  %v112_v22 = vld [vmem:[#allocation6 + $0x10] sm:$0xff]  ;;  %v154_v41 = vadd.s32 4294967288, %v152_v40  ;;  %v172_v54 = vmul.f32 %v171_v51, %v171_v51 }
  0x14   :  { %v126_v23 = vmul.f32 %v118_v12, %v118_v12  ;;  %v127_v24 = vmul.f32 %v119_v13, %v119_v13  ;;  %v113_v25 = vld [vmem:[#allocation6 + $0x18] sm:$0xff]  ;;  %v120_v26 = vsub.f32 %v104_v20, %v112_v22  ;;  %v141_v27 = vadd.f32 %v131_v17, %v130_v11 }
  0x15   :  { %v121_v28 = vsub.f32 %v105_v21, %v113_v25  ;;  %v132_v30 = vmul.f32 %v124_v18, %v124_v18  ;;  %v133_v31 = vmul.f32 %v125_v19, %v125_v19  ;;  %v173_v55 = vmul.f32 0.5, %v172_v54 }
  0x16   :  { %v135_v29 = vadd.f32 %v127_v24, %v126_v23  ;;  %142 = vadd.xlane.f32.xlu1 %v141_v27  ;;  %v128_v32 = vmul.f32 %v120_v26, %v120_v26  ;;  %v134_v49 = vld [vmem:[#allocation2] sm:$0x3] }
  0x17   :  { %v129_v33 = vmul.f32 %v121_v28, %v121_v28  ;;  %v144_v34 = vadd.f32 %v133_v31, %v132_v30 }
  0x18   :  { %136 = vadd.xlane.f32.xlu0 %v135_v29 }
  0x19   :  { %v138_v35 = vadd.f32 %v129_v33, %v128_v32 }
  0x1e   :  { %145 = vadd.xlane.f32.xlu1 %v144_v34 }
  0x20   :  { %139 = vadd.xlane.f32.xlu0 %v138_v35 }
  0x89   :  { %v143_v38 = vpop.xlane.xlu1 %142 }
  0x8a   :  { %v158_v43 = vperm.slane %v143_v38, %v152_v40 }
  0x8b   :  { %v137_v39 = vpop.xlane.xlu0 %136 }
  0x8c   :  { %v153_v46 = vperm.slane %v137_v39, %v152_v40 }
  0x91   :  { %v146_v42 = vpop.xlane.xlu1 %145 }
  0x92   :  { %v159_v44 = vperm.slane %v146_v42, %v154_v41 }
  0x93   :  { %v140_v45 = vpop.xlane.xlu0 %139 }
  0x94   :  { %v155_v47 = vperm.slane %v140_v45, %v154_v41  ;;  %v160_v48 = vsel %vm156_vm1, %v159_v44, %v158_v43 }
  0x96   :  { %v157_v50 = vsel %vm156_vm1, %v155_v47, %v153_v46 }
  0x97   :  { %v162_v52 = vsel %vm161_vm2, %v160_v48, %v157_v50 }
  0x98   :  { %v164_v53 = vadd.f32 %v162_v52, %v134_v49 }
  0x9a   :  { %166 = vst.msk [vmem:[#allocation2] sm:$0x3] %vm100_vm0, %v164_v53 }
  0xa1   :  { %v170_v56 = vld [vmem:[#allocation2] sm:$0x3] }
  0xa2   :  { %v492_v57 = vmul.f32 %v173_v55, %v170_v56 }
  0xa4   :  { %vm175_vm3 = vcmp.lt.f32.partialorder %v492_v57, 3e+38 }
  0xa5   :  { %v176_v58 = vsel %vm175_vm3, %v492_v57, -1e+30 }
  0xa6   :  { %v177_v59 = vsel %vm100_vm0, %v176_v58, -inf }
  0xa7   :  { %178 = vmax.xlane.f32.xlu2 %v177_v59 }
 0x11a   :  { %v497_v60 = vpop.xlane.xlu2 %178 }
 0x11b   :  { %vm191_vm4 = vcmp.lt.f32.partialorder %v492_v57, %v497_v60  ;;  %vm180_vm9 = vcmp.eq.f32.partialorder %v492_v57, %v497_v60 }
 0x11c   :  { %v192_v61 = vsel %vm191_vm4, %v492_v57, -1e+30  ;;  %v181_v11 = vsel %vm180_vm9, 1.0, %v458_v36 }
 0x11d   :  { %v193_v62 = vsel %vm100_vm0, %v192_v61, -inf  ;;  %v182_v12 = vsel %vm100_vm0, %v181_v11, 0.0 }
 0x11e   :  { %194 = vmax.xlane.f32.xlu2 %v193_v62 }
 0x191   :  { %v503_v63 = vpop.xlane.xlu2 %194 }
 0x192   :  { %vm207_vm5 = vcmp.lt.f32.partialorder %v492_v57, %v503_v63  ;;  %vm196_vm12 = vcmp.eq.f32.partialorder %v492_v57, %v503_v63 }
 0x193   :  { %v208_v0 = vsel %vm207_vm5, %v492_v57, -1e+30  ;;  %v197_v18 = vsel %vm196_vm12, 1.0, %v458_v36 }
 0x194   :  { %v209_v1 = vsel %vm100_vm0, %v208_v0, -inf  ;;  %v198_v19 = vsel %vm100_vm0, %v197_v18, 0.0 }
 0x195   :  { %210 = vmax.xlane.f32.xlu0 %v209_v1 }
 0x208   :  { %v509_v2 = vpop.xlane.xlu0 %210 }
 0x209   :  { %vm223_vm6 = vcmp.lt.f32.partialorder %v492_v57, %v509_v2  ;;  %vm212_vm1 = vcmp.eq.f32.partialorder %v492_v57, %v509_v2 }
 0x20a   :  { %v224_v3 = vsel %vm223_vm6, %v492_v57, -1e+30  ;;  %v213_v27 = vsel %vm212_vm1, 1.0, %v458_v36 }
 0x20b   :  { %v225_v4 = vsel %vm100_vm0, %v224_v3, -inf  ;;  %v214_v28 = vsel %vm100_vm0, %v213_v27, 0.0 }
 0x20c   :  { %226 = vmax.xlane.f32.xlu1 %v225_v4 }
 0x27f   :  { %v515_v5 = vpop.xlane.xlu1 %226 }
 0x280   :  { %vm239_vm7 = vcmp.lt.f32.partialorder %v492_v57, %v515_v5  ;;  %vm228_vm10 = vcmp.eq.f32.partialorder %v492_v57, %v515_v5 }
 0x281   :  { %v240_v6 = vsel %vm239_vm7, %v492_v57, -1e+30  ;;  %v229_v13 = vsel %vm228_vm10, 1.0, %v458_v36 }
 0x282   :  { %v241_v7 = vsel %vm100_vm0, %v240_v6, -inf  ;;  %v230_v14 = vsel %vm100_vm0, %v229_v13, 0.0 }
 0x283   :  { %242 = vmax.xlane.f32.xlu2 %v241_v7 }
 0x2f6   :  { %v521_v8 = vpop.xlane.xlu2 %242 }
 0x2f7   :  { %vm255_vm8 = vcmp.lt.f32.partialorder %v492_v57, %v521_v8  ;;  %vm244_vm13 = vcmp.eq.f32.partialorder %v492_v57, %v521_v8 }
 0x2f8   :  { %v256_v9 = vsel %vm255_vm8, %v492_v57, -1e+30  ;;  %v245_v20 = vsel %vm244_vm13, 1.0, %v458_v36 }
 0x2f9   :  { %v257_v10 = vsel %vm100_vm0, %v256_v9, -inf  ;;  %v246_v21 = vsel %vm100_vm0, %v245_v20, 0.0 }
 0x2fa   :  { %258 = vmax.xlane.f32.xlu0 %v257_v10 }
 0x302   :  { %183 = vadd.xlane.f32.xlu0 %v182_v12 }
 0x30a   :  { %231 = vadd.xlane.f32.xlu0 %v230_v14 }
 0x36d   :  { %v535_v15 = vpop.xlane.xlu0 %258 }
 0x36e   :  { %vm271_vm11 = vcmp.lt.f32.partialorder %v492_v57, %v535_v15  ;;  %vm260_vm2 = vcmp.eq.f32.partialorder %v492_v57, %v535_v15 }
 0x36f   :  { %v272_v16 = vsel %vm271_vm11, %v492_v57, -1e+30  ;;  %v261_v29 = vsel %vm260_vm2, 1.0, %v458_v36  ;;  %vm303_vm11 = vcmask 1024  }
 0x370   :  { %v273_v17 = vsel %vm100_vm0, %v272_v16, -inf  ;;  %v262_v30 = vsel %vm100_vm0, %v261_v29, 0.0 }
 0x371   :  { %274 = vmax.xlane.f32.xlu1 %v273_v17 }
 0x375   :  { %v184_v34 = vpop.xlane.xlu0 %183 }
 0x376   :  { %v185_v35 = vmin.f32 %v184_v34, 8.0 }
 0x378   :  { %v190_v38 = vsub.f32 8.0, %v185_v35  ;;  %v187_v52 = vmul.f32 %v185_v35, %v497_v60  ;;  %vm186_vm4 = vcmp.gt.f32.partialorder %v185_v35, 0.0 }
 0x379   :  { %199 = vadd.xlane.f32.xlu1 %v198_v19 }
 0x37a   :  { %v188_v58 = vsel %vm186_vm4, %v187_v52, 0.0 }
 0x37d   :  { %v232_v44 = vpop.xlane.xlu0 %231 }
 0x381   :  { %247 = vadd.xlane.f32.xlu1 %v246_v21 }
 0x3e4   :  { %v275_v22 = vpop.xlane.xlu1 %274 }
 0x3e5   :  { %vm287_vm14 = vcmp.lt.f32.partialorder %v492_v57, %v275_v22  ;;  %vm276_vm15 = vcmp.eq.f32.partialorder %v492_v57, %v275_v22 }
 0x3e6   :  { %v288_v23 = vsel %vm287_vm14, %v492_v57, -1e+30  ;;  %v277_v24 = vsel %vm276_vm15, 1.0, %v458_v36 }
 0x3e7   :  { %v289_v25 = vsel %vm100_vm0, %v288_v23, -inf  ;;  %v278_v26 = vsel %vm100_vm0, %v277_v24, 0.0 }
 0x3e8   :  { %290 = vmax.xlane.f32.xlu2 %v289_v25  ;;  %279 = vadd.xlane.f32.xlu0 %v278_v26 }
 0x3ec   :  { %v200_v37 = vpop.xlane.xlu1 %199 }
 0x3ed   :  { %v201_v39 = vmin.f32 %v200_v37, %v190_v38 }
 0x3ef   :  { %v206_v41 = vsub.f32 %v190_v38, %v201_v39  ;;  %v203_v51 = vmul.f32 %v201_v39, %v503_v63 }
 0x3f0   :  { %215 = vadd.xlane.f32.xlu2 %v214_v28 }
 0x3f4   :  { %v248_v47 = vpop.xlane.xlu1 %247 }
 0x3f8   :  { %263 = vadd.xlane.f32.xlu2 %v262_v30 }
 0x45b   :  { %v291_v31 = vpop.xlane.xlu2 %290 }
 0x45c   :  { %vm292_vm3 = vcmp.eq.f32.partialorder %v492_v57, %v291_v31  ;;  %v280_v57 = vpop.xlane.xlu0 %279 }
 0x45d   :  { %v293_v32 = vsel %vm292_vm3, 1.0, %v458_v36 }
 0x45e   :  { %v294_v33 = vsel %vm100_vm0, %v293_v32, 0.0  ;;  %vm202_vm0 = vcmp.gt.f32.partialorder %v201_v39, 0.0 }
 0x45f   :  { %295 = vadd.xlane.f32.xlu1 %v294_v33  ;;  %v204_v55 = vsel %vm202_vm0, %v203_v51, 0.0 }
 0x460   :  { %v205_v0 = vadd.f32 %v204_v55, %v188_v58 }
 0x463   :  { %v216_v40 = vpop.xlane.xlu2 %215 }
 0x464   :  { %v217_v42 = vmin.f32 %v216_v40, %v206_v41 }
 0x466   :  { %v222_v43 = vsub.f32 %v206_v41, %v217_v42  ;;  %v219_v53 = vmul.f32 %v217_v42, %v509_v2  ;;  %vm218_vm5 = vcmp.gt.f32.partialorder %v217_v42, 0.0 }
 0x468   :  { %v233_v45 = vmin.f32 %v232_v44, %v222_v43  ;;  %v220_v59 = vsel %vm218_vm5, %v219_v53, 0.0 }
 0x469   :  { %v221_v1 = vadd.f32 %v220_v59, %v205_v0 }
 0x46a   :  { %v238_v46 = vsub.f32 %v222_v43, %v233_v45  ;;  %v235_v56 = vmul.f32 %v233_v45, %v515_v5  ;;  %vm234_vm6 = vcmp.gt.f32.partialorder %v233_v45, 0.0 }
 0x46b   :  { %v264_v50 = vpop.xlane.xlu2 %263 }
 0x46c   :  { %v249_v48 = vmin.f32 %v248_v47, %v238_v46  ;;  %v236_v63 = vsel %vm234_vm6, %v235_v56, 0.0 }
 0x46d   :  { %v237_v4 = vadd.f32 %v236_v63, %v221_v1 }
 0x46e   :  { %v254_v49 = vsub.f32 %v238_v46, %v249_v48  ;;  %v251_v61 = vmul.f32 %v249_v48, %v521_v8  ;;  %vm250_vm7 = vcmp.gt.f32.partialorder %v249_v48, 0.0 }
 0x470   :  { %v265_v36 = vmin.f32 %v264_v50, %v254_v49  ;;  %v252_v2 = vsel %vm250_vm7, %v251_v61, 0.0 }
 0x471   :  { %v253_v9 = vadd.f32 %v252_v2, %v237_v4 }
 0x472   :  { %v270_v54 = vsub.f32 %v254_v49, %v265_v36  ;;  %v267_v60 = vmul.f32 %v265_v36, %v535_v15  ;;  %vm266_vm8 = vcmp.gt.f32.partialorder %v265_v36, 0.0 }
 0x474   :  { %v281_v62 = vmin.f32 %v280_v57, %v270_v54  ;;  %v268_v6 = vsel %vm266_vm8, %v267_v60, 0.0 }
 0x475   :  { %v269_v12 = vadd.f32 %v268_v6, %v253_v9 }
 0x476   :  { %v283_v3 = vmul.f32 %v281_v62, %v275_v22  ;;  %vm282_vm9 = vcmp.gt.f32.partialorder %v281_v62, 0.0  ;;  %v286_v5 = vsub.f32 %v270_v54, %v281_v62 }
 0x478   :  { %v284_v11 = vsel %vm282_vm9, %v283_v3, 0.0 }
 0x479   :  { %v285_v13 = vadd.f32 %v284_v11, %v269_v12 }
 0x4d2   :  { %v296_v7 = vpop.xlane.xlu1 %295 }
 0x4d3   :  { %v297_v10 = vmin.f32 %v296_v7, %v286_v5 }
 0x4d5   :  { %vm298_vm10 = vcmp.gt.f32.partialorder %v297_v10, 0.0  ;;  %v299_v8 = vmul.f32 %v297_v10, %v291_v31 }
 0x4d7   :  { %v300_v14 = vsel %vm298_vm10, %v299_v8, 0.0 }
 0x4d8   :  { %v301_v16 = vadd.f32 %v300_v14, %v285_v13 }
 0x4da   :  { %v304_v15 = vsel %vm303_vm11, %v301_v16, 0.0 }
 0x4db   :  { %305 = vadd.xlane.f32.xlu2 %v304_v15 }
 0x54e   :  { %v306_v17 = vpop.xlane.xlu2 %305 }
 0x54f   :  { %v307_v18 = vrot.slane %v306_v17, 4 }
 0x551   :  { %v308_v19 = vadd.f32 %v307_v18, %v306_v17 }
 0x553   :  { %v309_v20 = vrot.slane %v308_v19, 2 }
 0x555   :  { %v310_v21 = vadd.f32 %v309_v20, %v308_v19 }
 0x557   :  { %v311_v22 = vrot.slane %v310_v21, 1 }
 0x559   :  { %v312_v23 = vadd.f32 %v311_v22, %v310_v21 }
 0x55b   :  { %342 = vpush %v312_v23 }
 0x58c   :  { %s343_s0 = spop %342 }
 0x58d   :  { %s314_s29 = smul.f32 0.0625, %s343_s0 }
 0x58f   :  { %v315_v24 = vstv %s314_s29 }
 0x590   :  { %317 = vst [vmem:[#allocation9] sm:$0xff] %v315_v24 }
 0x591   :  { %328 = dma.vmem_to_hbm [thread:$0]  %s324_s28, 128, %s326_s5, [#allocation5]  }
 0x592   :  { %451 = dma.done.wait [#allocation5], 128  }
 0x593   :  { %452 = vsyncadd [#allocation5], 4294967168 }
 0x594   :  { %333 = vsyncpa [#allocation4], 1 }
 0x595   :  { %334 = vsyncpa [#allocation7], 1 }
 0x596   :  { %335 = vsyncpa [#allocation5], 1 }

</bundles_post_ra>
